<compile_context>
chip_gen: v6e
topology: v6e:2x2x1
jax: 0.10.0
libtpu: 0.0.40
codegen_flags: <defaults>
</compile_context>

<pallas_src>
import math

import jax
import jax.numpy as jnp
from jax.experimental import pallas as pl
from jax.experimental.pallas import tpu as pltpu

TEMPERATURE = 2.0              # deterministic "parameter" of the stand-in loss_fn
_MIN_KERNEL_ELEMS = 8 * 128    # below one (8,128) vreg tile: plain XLA is faster


def _distance_transform_kernel(x_ref, o_ref):
    x = x_ref[...]
    d = jnp.maximum(x, 0)                              # relu  (VPU)
    o_ref[...] = jnp.exp(d * (-1.0 / TEMPERATURE))     # scale (VPU) + exp (EUP)


def _distance_transform_ref(x):
    # Pure-JAX reference / fast path (same math as the kernel).
    return jnp.exp(jnp.maximum(x, 0) * (-1.0 / TEMPERATURE)).astype(x.dtype)


def _min_sublane(dtype):
    itemsize = jnp.dtype(dtype).itemsize
    return {4: 8, 2: 16, 1: 32}.get(itemsize, 8)


def _choose_tiling(total, dtype):
    """Return (lane, rows, tm). lane divides total; tm is min-sublane-aligned
    or equals the full row count."""
    itemsize = jnp.dtype(dtype).itemsize
    min_sub = _min_sublane(dtype)

    lane = 128
    for cand in (1024, 512, 256):
        if total % cand == 0:
            lane = cand
            break
    rows = total // lane

    # ~2 MiB per block: in+out double-buffering ~= 8 MiB on every generation.
    tm = max(min_sub, ((2 << 20) // (lane * itemsize)) // min_sub * min_sub)

    if rows <= tm:
        if rows >= 2 * min_sub:
            # Split so the grid has >= 2 steps: both v7x TensorCores get work.
            half = -(-rows // 2)
            tm = -(-half // min_sub) * min_sub
        else:
            tm = rows  # block dim == full array dim (allowed even if < 8)
    return lane, rows, tm


@jax.jit
def normalizer_forward(x):
    """x: float array (any shape, e.g. NCHW). Returns distance_transform(x),
    same shape/dtype."""
    orig_shape = x.shape
    total = math.prod(orig_shape)

    # Fast path: tiny tensors or element counts not divisible by 128.
    # (Avoids any pad/slice HBM copies; a fused XLA elementwise op is optimal.)
    if total < _MIN_KERNEL_ELEMS or total % 128 != 0:
        return _distance_transform_ref(x)

    lane, rows, tm = _choose_tiling(total, x.dtype)
    num_tiles = -(-rows // tm)          # last block may be partial (masked stores)
    itemsize = jnp.dtype(x.dtype).itemsize

    x2d = x.reshape(rows, lane)         # lane-dense view; no padding, no copy

    out2d = pl.pallas_call(
        _distance_transform_kernel,
        out_shape=jax.ShapeDtypeStruct((rows, lane), x.dtype),
        grid_spec=pltpu.PrefetchScalarGridSpec(
            num_scalar_prefetch=0,
            grid=(num_tiles,),
            in_specs=[pl.BlockSpec((tm, lane), lambda i: (i, 0))],
            out_specs=pl.BlockSpec((tm, lane), lambda i: (i, 0)),
        ),
        compiler_params=pltpu.CompilerParams(
            # Elementwise & embarrassingly parallel: shard grid across v7x TCs.
            dimension_semantics=("parallel",),
        ),
        cost_estimate=pl.CostEstimate(
            flops=2 * total,
            transcendentals=total,
            bytes_accessed=2 * total * itemsize,
        ),
    )(x2d)

    return out2d.reshape(orig_shape)


if __name__ == "__main__":
    key = jax.random.PRNGKey(0)
    k1, k2, k3 = jax.random.split(key, 3)

    tests = [
        # module-like NCHW input (single-tile kernel path)
        jax.random.normal(k1, (2, 4, 16, 16), dtype=jnp.float32),
        # multi-tile grid (exercises the >=2-step parallel grid)
        jax.random.normal(k2, (2, 8, 64, 128), dtype=jnp.float32),
        # partial last block (exercises masked stores, no padding)
        jax.random.normal(k3, (17, 32, 32), dtype=jnp.float32),
    ]

    for x in tests:
        out = jax.block_until_ready(normalizer_forward(x))
        ref = _distance_transform_ref(x)
        assert out.shape == x.shape and out.dtype == x.dtype
        assert float(jnp.max(jnp.abs(out - ref))) < 1e-5

    print("KERNEL_OK")
</pallas_src>

<mosaic_0001>
module attributes {stable_mosaic.version = 11 : i64} {
  func.func @_distance_transform_kernel(%arg0: i32, %arg1: memref<2x1024xf32, #tpu.memory_space<vmem>>, %arg2: memref<2x1024xf32, #tpu.memory_space<vmem>>) attributes {dimension_semantics = [#tpu.dimension_semantics<parallel>], iteration_bounds = array<i64: 1>, scalar_prefetch = 0 : i64, scratch_operands = 0 : i64, tpu.core_type = #tpu.core_type<tc>, window_params = [{transform_indices = @transform_0, window_bounds = array<i64: 2, 1024>}, {transform_indices = @transform_1, window_bounds = array<i64: 2, 1024>}]} {
    %c0 = arith.constant 0 : index
    %c0_0 = arith.constant 0 : index
    %0 = vector.load %arg1[%c0, %c0_0] : memref<2x1024xf32, #tpu.memory_space<vmem>>, vector<2x1024xf32>
    %cst = arith.constant 0.000000e+00 : f32
    %1 = vector.broadcast %cst : f32 to vector<2x1024xf32>
    %2 = arith.maximumf %0, %1 : vector<2x1024xf32>
    %cst_1 = arith.constant -5.000000e-01 : f32
    %3 = vector.broadcast %cst_1 : f32 to vector<2x1024xf32>
    %4 = arith.mulf %2, %3 : vector<2x1024xf32>
    %5 = math.exp %4 : vector<2x1024xf32>
    %c0_2 = arith.constant 0 : index
    %c0_3 = arith.constant 0 : index
    %6 = vector.load %arg2[%c0_2, %c0_3] : memref<2x1024xf32, #tpu.memory_space<vmem>>, vector<2x1024xf32>
    tpu.vector_store %arg2[%c0_2, %c0_3], %5 {strides = array<i32>} : memref<2x1024xf32, #tpu.memory_space<vmem>>, vector<2x1024xf32>,
    return
  }
  func.func @transform_0(%arg0: i32) -> (i32, i32) {
    %c0_i32 = arith.constant 0 : i32
    %c0_i32_0 = arith.constant 0 : i32
    return %arg0, %c0_i32 : i32, i32
  }
  func.func @transform_1(%arg0: i32) -> (i32, i32) {
    %c0_i32 = arith.constant 0 : i32
    %c0_i32_0 = arith.constant 0 : i32
    return %arg0, %c0_i32 : i32, i32
  }
}

</mosaic_0001>

<bundles_post_ra>
// kernel: normalizer_forward.1
= control target key start
LH: loop header
LB: loop body
LE: loop exit
PB: predicated region body
PF: predicated region fallthrough
CT: control target
= control target key end

     0   :  { %s50_s0 = inlined_call_operand.vmem [shape: f32[2,1024], index: 0, kind: input, shape index: {}]   ;;  %s51_s1 = inlined_call_operand.vmem [shape: f32[2,1024], index: 1, kind: output, shape index: {}]  }
   0x1   :  { %v8_v0 = vld [vmem:[%s50_s0] sm:$0xff]  ;;  %v9_v1 = vld [vmem:[%s50_s0 + $0x8] sm:$0xff] }
   0x2   :  { %v10_v2 = vmax.f32 %v8_v0, 0.0  ;;  %v11_v3 = vmax.f32 %v9_v1, 0.0 }
   0x4   :  { %v12_v4 = vmul.f32 -0.5, %v10_v2  ;;  %v13_v5 = vmul.f32 -0.5, %v11_v3 }
   0x6   :  { %v14_v6 = vmul.f32 1.442695, %v12_v4  ;;  %v16_v7 = vmul.f32 1.442695, %v13_v5 }
   0x8   :  { %24 = vpow2.f32 %v14_v6 }
   0x9   :  { %26 = vpow2.f32 %v16_v7 }
  0x15   :  { %v25_v8 = vpop.eup %24 }
  0x16   :  { %v27_v9 = vpop.eup %26  ;;  %18 = vst [vmem:[%s51_s1] sm:$0xff] %v25_v8 }
  0x17   :  { %19 = vst [vmem:[%s51_s1 + $0x8] sm:$0xff] %v27_v9 }

</bundles_post_ra>
